<compile_context>
chip_gen: v6e
topology: v6e:2x2x1
jax: 0.10.0
libtpu: 0.0.40
codegen_flags: <defaults>
</compile_context>

<pallas_src>
import math

import numpy as np

import jax
import jax.numpy as jnp
from jax.experimental import pallas as pl
from jax.experimental.pallas import tpu as pltpu

LANE = 128


def _round_up(v, m):
    return ((v + m - 1) // m) * m


# ----------------------------------------------------------------------------
# Pallas kernel: fused GAP + backbone Linear + all multi-output heads
# ----------------------------------------------------------------------------
def _mac_kernel(x_ref, w_ref, b_ref, out_ref, acc_ref):
    # x_ref:   [TILE_N, C, TILE_HW]  raw NCHW slab (free reshape; no transpose)
    # w_ref:   [C, T_pad]            fused (backbone @ heads) weight, already / HW
    # b_ref:   [1, T_pad]            fused bias
    # out_ref: [TILE_N, T_pad]       logits block (resident across the HW axis)
    # acc_ref: [TILE_N, C, 1] f32    channel-sum accumulator (tiny)
    j = pl.program_id(1)

    @pl.when(j == 0)
    def _init():
        acc_ref[...] = jnp.zeros_like(acc_ref)

    # Global-average-pool partial sums for this HW slab.  VPU adds + a final
    # XLU lane-reduce per sublane group; this sits far below the x DMA stream,
    # so the kernel stays HBM-bound reading x exactly once (f32 or bf16 input).
    acc_ref[...] += jnp.sum(x_ref[...].astype(jnp.float32), axis=-1, keepdims=True)

    @pl.when(j == pl.num_programs(1) - 1)
    def _finalize():
        # Tiny K=C contraction fusing the GAP means with the combined
        # backbone+heads weight; runs once per batch tile.  Unrolled as C
        # broadcast-FMAs (avoids a sub-tile-K MXU matmul; cost is negligible).
        sums = acc_ref[...]                       # [TILE_N, C, 1] channel sums
        w = w_ref[...]                            # [C, T_pad] (1/HW pre-folded)
        res = b_ref[...].astype(jnp.float32)      # [1, T_pad] -> broadcasts up
        for c in range(w_ref.shape[0]):           # static C, unrolled
            res = res + sums[:, c, :] * w[c:c + 1, :]
        out_ref[...] = res.astype(out_ref.dtype)


# ----------------------------------------------------------------------------
# Parameter construction (deterministic, mimics torch.nn.Linear init bounds)
# ----------------------------------------------------------------------------
def _linear_params(key, in_f, out_f):
    kw, kb = jax.random.split(key)
    bound = 1.0 / math.sqrt(in_f)
    w = jax.random.uniform(kw, (in_f, out_f), jnp.float32, -bound, bound)
    b = jax.random.uniform(kb, (1, out_f), jnp.float32, -bound, bound)
    return w, b


def make_multi_attribute_classifier(attribute_sizes, in_channels, feature_dim, key):
    """Builds deterministic parameters mirroring MultiAttributeClassifier.__init__."""
    sizes = np.asarray(attribute_sizes, dtype=np.int64)
    # sorted unique + counts, identical semantics to torch.Tensor.unique(sorted=True)
    unique_sizes, counts = np.unique(sizes, return_counts=True)

    keys = jax.random.split(key, len(unique_sizes) + 1)
    # TODO(synk): final_layer_output is abstract in the reference module; a
    # GAP + Linear(in_channels -> feature_dim) stand-in backbone is used here.
    wb, bb = _linear_params(keys[0], in_channels, feature_dim)

    head_ws, head_bs, head_meta = [], [], []
    for i, (size, freq) in enumerate(zip(unique_sizes.tolist(), counts.tolist())):
        out_f = freq if size == 2 else freq * size
        w, b = _linear_params(keys[i + 1], feature_dim, out_f)
        head_ws.append(w)
        head_bs.append(b)
        head_meta.append((size, freq, out_f))

    wh = jnp.concatenate(head_ws, axis=1)  # [F, total_out]
    bh = jnp.concatenate(head_bs, axis=1)  # [1, total_out]
    return dict(
        wb=wb, bb=bb, wh=wh, bh=bh,
        # Fused weight/bias, hoisted out of the per-call path (review item):
        # no nonlinearity sits between the backbone Linear and the heads, so
        #   logits = mean_hw(x) @ (wb @ wh) + (bb @ wh + bh)
        w_fused=wb @ wh,            # [C, T]
        b_fused=bb @ wh + bh,       # [1, T]
        head_meta=head_meta,
    )


# ----------------------------------------------------------------------------
# Forward pass (Pallas kernel + glue reshapes)
# ----------------------------------------------------------------------------
def _vmem_capacity_bytes():
    try:
        return int(pltpu.get_tpu_info().vmem_capacity_bytes)
    except Exception:
        return 64 * 1024 * 1024  # conservative fallback (v7x-sized)


def multi_attribute_forward(x_nchw, params, *, tile_n=None, tile_hw=None):
    N, C, H, W = x_nchw.shape
    HW = H * W
    itemsize = jnp.dtype(x_nchw.dtype).itemsize
    sub = 8 * max(1, 4 // itemsize)     # sublane tile rows: 8 (f32) / 16 (bf16)
    c_rows = _round_up(C, sub)          # VMEM rows the C dim pads to

    w_fused, b_fused = params["w_fused"], params["b_fused"]
    T = w_fused.shape[1]
    T_pad = _round_up(T, LANE)          # lane-dense output (unmasked stores)

    # 1/HW (true HW, not padded) folded into the fused weight so the in-kernel
    # channel sums become means implicitly; zero padding contributes nothing.
    w_k = jnp.pad(w_fused * (1.0 / HW), ((0, 0), (0, T_pad - T))).astype(jnp.float32)
    b_k = jnp.pad(b_fused, ((0, 0), (0, T_pad - T))).astype(jnp.float32)

    # ---- generation-aware VMEM budget (v7x has only 64 MiB physical) ----
    cap = _vmem_capacity_bytes()
    budget = min(96 * 1024 * 1024, int(0.75 * cap))  # ~96 MiB v5e/v6e, ~48 MiB v7x

    # ---- batch tile: keep >=2 programs on the parallel axis (v7x megacore) ----
    if tile_n is None:
        tile_n = _round_up(-(-N // 2), 8) if N >= 16 else _round_up(max(N, 1), 8)
        tile_n = min(tile_n, 128)
    tile_n = max(8, _round_up(tile_n, 8))
    N_pad = _round_up(N, tile_n)

    def _x_vmem_bytes(thw):
        # double-buffered native-dtype block + one f32 temp for the cast+reduce
        return (2 * tile_n * c_rows * thw * itemsize
                + tile_n * _round_up(C, 8) * thw * 4)

    # ---- HW tile: small-problem fast path, else multi-MB blocks ----
    if tile_hw is None:
        if _x_vmem_bytes(HW) <= budget // 2 or HW <= LANE:
            tile_hw = HW                 # single reduction step: no per-step overhead
        else:
            # target ~4 MiB of x data per step, capped by the VMEM budget
            thw = max(LANE, ((4 << 20) // max(1, tile_n * C * itemsize)) // LANE * LANE)
            while thw > LANE and _x_vmem_bytes(thw) > (budget * 3) // 5:
                thw = max(LANE, (thw // 2) // LANE * LANE)
            tile_hw = HW if thw >= HW else thw
    assert tile_hw == HW or tile_hw % LANE == 0, \
        "tile_hw must equal HW or be a multiple of 128"
    HW_pad = HW if tile_hw == HW else _round_up(HW, tile_hw)

    # ---- free reshape of the NCHW input; pad only if the tiles don't divide ----
    x3 = x_nchw.reshape(N, C, HW)
    if N_pad != N or HW_pad != HW:
        # Zero padding contributes 0 to the channel sums.  (This is an extra
        # copy; default tile selection avoids it when shapes divide, as here.)
        x3 = jnp.pad(x3, ((0, N_pad - N), (0, 0), (0, HW_pad - HW)))

    grid = (N_pad // tile_n, HW_pad // tile_hw)

    # ---- explicit VMEM limit; never below the tiles' requirement (review) ----
    vmem_est = (_x_vmem_bytes(tile_hw)                       # input blocks + f32 temp
                + 2 * tile_n * T_pad * 4                     # output block
                + 2 * (_round_up(C, 8) + 8) * T_pad * 4      # resident w + b (~KBs)
                + tile_n * 8 * LANE * 4)                     # acc scratch (padded)
    vmem_limit = int(min(budget, max(4 * vmem_est, 32 * 1024 * 1024)))
    vmem_limit = max(vmem_limit, vmem_est + (2 << 20))       # don't under-budget
    vmem_limit = int(min(vmem_limit, int(0.9 * cap)))

    logits_padded = pl.pallas_call(
        _mac_kernel,
        out_shape=jax.ShapeDtypeStruct((N_pad, T_pad), jnp.float32),
        grid_spec=pltpu.PrefetchScalarGridSpec(
            num_scalar_prefetch=0,
            grid=grid,
            in_specs=[
                pl.BlockSpec((tile_n, C, tile_hw), lambda i, j: (i, 0, j)),
                pl.BlockSpec((C, T_pad), lambda i, j: (0, 0)),   # resident, ~2 KB
                pl.BlockSpec((1, T_pad), lambda i, j: (0, 0)),   # resident
            ],
            out_specs=pl.BlockSpec((tile_n, T_pad), lambda i, j: (i, 0)),
            scratch_shapes=[pltpu.VMEM((tile_n, C, 1), jnp.float32)],
        ),
        compiler_params=pltpu.CompilerParams(
            dimension_semantics=("parallel", "arbitrary"),  # batch parallel (megacore)
            vmem_limit_bytes=vmem_limit,
        ),
    )(x3, w_k, b_k)

    logits = logits_padded[:N, :T]

    # Split the fused head output exactly like the per-module loop in forward():
    # binary heads stay [N, freq]; categorical heads reshape to [N, size, freq].
    multi_output_class_logits = []
    col = 0
    for size, freq, out_f in params["head_meta"]:
        head = logits[:, col: col + out_f]
        if size != 2:
            head = head.reshape(-1, size, freq)
        multi_output_class_logits.append(head)
        col += out_f
    return multi_output_class_logits


# ----------------------------------------------------------------------------
# Pure-JAX reference (unfused) for correctness checking
# ----------------------------------------------------------------------------
def _reference_forward(x_nchw, params):
    feat0 = jnp.mean(x_nchw.astype(jnp.float32), axis=(2, 3))  # [N, C] GAP
    feat = feat0 @ params["wb"] + params["bb"]                  # [N, F]
    logits = feat @ params["wh"] + params["bh"]                 # [N, T]
    outs, col = [], 0
    for size, freq, out_f in params["head_meta"]:
        head = logits[:, col: col + out_f]
        if size != 2:
            head = head.reshape(-1, size, freq)
        outs.append(head)
        col += out_f
    return outs


if __name__ == "__main__":
    key = jax.random.PRNGKey(0)
    k_x, k_p = jax.random.split(key)

    # 16 images, 3 channels, 32x32 spatial, backbone feature dim 32,
    # attributes: two binary, two 3-class, one 5-class.
    attribute_sizes = [2, 2, 3, 3, 5]
    N, C, H, W = 16, 3, 32, 32
    feature_dim = 32

    x = jax.random.normal(k_x, (N, C, H, W), dtype=jnp.float32)
    params = make_multi_attribute_classifier(attribute_sizes, C, feature_dim, k_p)
    expected_shapes = [(N, 2), (N, 3, 2), (N, 5, 1)]

    def check(outs, refs, atol):
        for o, r, s in zip(outs, refs, expected_shapes):
            assert o.shape == s, (o.shape, s)
            err = float(jnp.max(jnp.abs(o.astype(jnp.float32) - r)))
            assert err <= atol, err

    refs_f32 = _reference_forward(x, params)

    # 1) Default tiles: small-problem fast path (single HW step) with two
    #    programs on the parallel batch axis -> grid (2, 1).
    outs = jax.block_until_ready(multi_attribute_forward(x, params))
    check(outs, refs_f32, 2e-5)

    # 2) Forced multi-step HW reduction (exercises the accumulator path): grid (2, 4).
    outs = jax.block_until_ready(multi_attribute_forward(x, params, tile_n=8, tile_hw=256))
    check(outs, refs_f32, 2e-5)

    # 3) bf16 input streams half the HBM bytes; accumulation stays f32.
    x_bf16 = x.astype(jnp.bfloat16)
    refs_bf16 = _reference_forward(x_bf16, params)
    outs = jax.block_until_ready(multi_attribute_forward(x_bf16, params))
    check(outs, refs_bf16, 2e-3)

    print("KERNEL_OK")
</pallas_src>

<mosaic_0001>
module attributes {stable_mosaic.version = 11 : i64} {
  func.func @_mac_kernel(%arg0: i32, %arg1: i32, %arg2: memref<8x3x1024xf32, #tpu.memory_space<vmem>>, %arg3: memref<3x128xf32, #tpu.memory_space<vmem>>, %arg4: memref<1x128xf32, #tpu.memory_space<vmem>>, %arg5: memref<8x128xf32, #tpu.memory_space<vmem>>, %arg6: memref<8x3x1xf32, #tpu.memory_space<vmem>>) attributes {dimension_semantics = [#tpu.dimension_semantics<parallel>, #tpu.dimension_semantics<arbitrary>], iteration_bounds = array<i64: 2, 1>, scalar_prefetch = 0 : i64, scratch_operands = 1 : i64, tpu.core_type = #tpu.core_type<tc>, window_params = [{transform_indices = @transform_0, window_bounds = array<i64: 8, 3, 1024>}, {pipeline_mode = #tpu.pipeline_mode<synchronous>, transform_indices = @transform_1, window_bounds = array<i64: 3, 128>}, {pipeline_mode = #tpu.pipeline_mode<synchronous>, transform_indices = @transform_2, window_bounds = array<i64: 1, 128>}, {transform_indices = @transform_3, window_bounds = array<i64: 8, 128>}]} {
    %c0_i32 = arith.constant 0 : i32
    %0 = arith.cmpi eq, %arg1, %c0_i32 : i32
    %1 = arith.extui %0 : i1 to i32
    %c0_i32_0 = arith.constant 0 : i32
    %2 = arith.cmpi ne, %1, %c0_i32_0 : i32
    scf.if %2 {
      %cst_11 = arith.constant 0.000000e+00 : f32
      %12 = vector.broadcast %cst_11 : f32 to vector<8x3x1xf32>
      %c0_12 = arith.constant 0 : index
      %c0_13 = arith.constant 0 : index
      %c0_14 = arith.constant 0 : index
      %13 = vector.load %arg6[%c0_12, %c0_13, %c0_14] : memref<8x3x1xf32, #tpu.memory_space<vmem>>, vector<8x3x1xf32>
      tpu.vector_store %arg6[%c0_12, %c0_13, %c0_14], %12 {strides = array<i32>} : memref<8x3x1xf32, #tpu.memory_space<vmem>>, vector<8x3x1xf32>,
    } else {
    }
    %c0 = arith.constant 0 : index
    %c0_1 = arith.constant 0 : index
    %c0_2 = arith.constant 0 : index
    %3 = vector.load %arg6[%c0, %c0_1, %c0_2] : memref<8x3x1xf32, #tpu.memory_space<vmem>>, vector<8x3x1xf32>
    %c0_3 = arith.constant 0 : index
    %c0_4 = arith.constant 0 : index
    %c0_5 = arith.constant 0 : index
    %4 = vector.load %arg2[%c0_3, %c0_4, %c0_5] : memref<8x3x1024xf32, #tpu.memory_space<vmem>>, vector<8x3x1024xf32>
    %cst = arith.constant dense<0.000000e+00> : vector<8x3xf32>
    %5 = vector.multi_reduction <add>, %4, %cst [2] : vector<8x3x1024xf32> to vector<8x3xf32>
    %6 = vector.shape_cast %5 : vector<8x3xf32> to vector<8x3x1xf32>
    %7 = arith.addf %3, %6 : vector<8x3x1xf32>
    %c0_6 = arith.constant 0 : index
    %c0_7 = arith.constant 0 : index
    %c0_8 = arith.constant 0 : index
    %8 = vector.load %arg6[%c0_6, %c0_7, %c0_8] : memref<8x3x1xf32, #tpu.memory_space<vmem>>, vector<8x3x1xf32>
    tpu.vector_store %arg6[%c0_6, %c0_7, %c0_8], %7 {strides = array<i32>} : memref<8x3x1xf32, #tpu.memory_space<vmem>>, vector<8x3x1xf32>,
    %c0_i32_9 = arith.constant 0 : i32
    %9 = arith.cmpi eq, %arg1, %c0_i32_9 : i32
    %10 = arith.extui %9 : i1 to i32
    %c0_i32_10 = arith.constant 0 : i32
    %11 = arith.cmpi ne, %10, %c0_i32_10 : i32
    scf.if %11 {
      %c0_11 = arith.constant 0 : index
      %c0_12 = arith.constant 0 : index
      %c0_13 = arith.constant 0 : index
      %12 = vector.load %arg6[%c0_11, %c0_12, %c0_13] : memref<8x3x1xf32, #tpu.memory_space<vmem>>, vector<8x3x1xf32>
      %c0_14 = arith.constant 0 : index
      %c0_15 = arith.constant 0 : index
      %13 = vector.load %arg3[%c0_14, %c0_15] : memref<3x128xf32, #tpu.memory_space<vmem>>, vector<3x128xf32>
      %c0_16 = arith.constant 0 : index
      %c0_17 = arith.constant 0 : index
      %14 = vector.load %arg4[%c0_16, %c0_17] : memref<1x128xf32, #tpu.memory_space<vmem>>, vector<1x128xf32>
      %15 = vector.extract_strided_slice %12 {offsets = [0, 0, 0], sizes = [8, 1, 1], strides = [1, 1, 1]} : vector<8x3x1xf32> to vector<8x1x1xf32>
      %16 = vector.shape_cast %15 : vector<8x1x1xf32> to vector<8x1xf32>
      %17 = vector.extract_strided_slice %13 {offsets = [0, 0], sizes = [1, 128], strides = [1, 1]} : vector<3x128xf32> to vector<1x128xf32>
      %18 = vector.broadcast %16 : vector<8x1xf32> to vector<8x128xf32>
      %19 = vector.broadcast %17 : vector<1x128xf32> to vector<8x128xf32>
      %20 = arith.mulf %18, %19 : vector<8x128xf32>
      %21 = vector.broadcast %14 : vector<1x128xf32> to vector<8x128xf32>
      %22 = arith.addf %21, %20 : vector<8x128xf32>
      %23 = vector.extract_strided_slice %12 {offsets = [0, 1, 0], sizes = [8, 1, 1], strides = [1, 1, 1]} : vector<8x3x1xf32> to vector<8x1x1xf32>
      %24 = vector.shape_cast %23 : vector<8x1x1xf32> to vector<8x1xf32>
      %25 = vector.extract_strided_slice %13 {offsets = [1, 0], sizes = [1, 128], strides = [1, 1]} : vector<3x128xf32> to vector<1x128xf32>
      %26 = vector.broadcast %24 : vector<8x1xf32> to vector<8x128xf32>
      %27 = vector.broadcast %25 : vector<1x128xf32> to vector<8x128xf32>
      %28 = arith.mulf %26, %27 : vector<8x128xf32>
      %29 = arith.addf %22, %28 : vector<8x128xf32>
      %30 = vector.extract_strided_slice %12 {offsets = [0, 2, 0], sizes = [8, 1, 1], strides = [1, 1, 1]} : vector<8x3x1xf32> to vector<8x1x1xf32>
      %31 = vector.shape_cast %30 : vector<8x1x1xf32> to vector<8x1xf32>
      %32 = vector.extract_strided_slice %13 {offsets = [2, 0], sizes = [1, 128], strides = [1, 1]} : vector<3x128xf32> to vector<1x128xf32>
      %33 = vector.broadcast %31 : vector<8x1xf32> to vector<8x128xf32>
      %34 = vector.broadcast %32 : vector<1x128xf32> to vector<8x128xf32>
      %35 = arith.mulf %33, %34 : vector<8x128xf32>
      %36 = arith.addf %29, %35 : vector<8x128xf32>
      %c0_18 = arith.constant 0 : index
      %c0_19 = arith.constant 0 : index
      %37 = vector.load %arg5[%c0_18, %c0_19] : memref<8x128xf32, #tpu.memory_space<vmem>>, vector<8x128xf32>
      tpu.vector_store %arg5[%c0_18, %c0_19], %36 {strides = array<i32>} : memref<8x128xf32, #tpu.memory_space<vmem>>, vector<8x128xf32>,
    } else {
    }
    return
  }
  func.func @transform_0(%arg0: i32, %arg1: i32) -> (i32, i32, i32) {
    %c0_i32 = arith.constant 0 : i32
    %c0_i32_0 = arith.constant 0 : i32
    return %arg0, %c0_i32, %arg1 : i32, i32, i32
  }
  func.func @transform_1(%arg0: i32, %arg1: i32) -> (i32, i32) {
    %c0_i32 = arith.constant 0 : i32
    %c0_i32_0 = arith.constant 0 : i32
    %c0_i32_1 = arith.constant 0 : i32
    return %c0_i32, %c0_i32_0 : i32, i32
  }
  func.func @transform_2(%arg0: i32, %arg1: i32) -> (i32, i32) {
    %c0_i32 = arith.constant 0 : i32
    %c0_i32_0 = arith.constant 0 : i32
    %c0_i32_1 = arith.constant 0 : i32
    return %c0_i32, %c0_i32_0 : i32, i32
  }
  func.func @transform_3(%arg0: i32, %arg1: i32) -> (i32, i32) {
    %c0_i32 = arith.constant 0 : i32
    %c0_i32_0 = arith.constant 0 : i32
    return %arg0, %c0_i32 : i32, i32
  }
}

</mosaic_0001>

<bundles_post_ra>
// kernel: tpu_custom_call.1
= control target key start
LH: loop header
LB: loop body
LE: loop exit
PB: predicated region body
PF: predicated region fallthrough
CT: control target
= control target key end

     0   :  { %8 = vsyncpa [#allocation4], 0  ;;  %s1220_s0 = inlined_call_operand.vmem [shape: f32[16,3,1024], index: 0, kind: input, shape index: {}]   ;;  %s1221_s1 = inlined_call_operand.vmem [shape: f32[3,128], index: 1, kind: input, shape index: {}]   ;;  %s1222_s2 = inlined_call_operand.vmem [shape: f32[1,128], index: 2, kind: input, shape index: {}]   ;;  %s1223_s3 = inlined_call_operand.hbm [shape: f32[16,128], index: 3, kind: output, shape index: {}]  }
   0x1   :  { %10 = vsyncpa [#allocation4 + $0x1], 0  ;;  %s974_s12 = smov 0   ;;  %s976_s13 = smov 0  }
   0x2   :  { %s978_s14 = smov 0   ;;  %s980_s15 = smov 0  }
   0x3   :  { %s982_s16 = smov 0   ;;  %s984_s17 = smov 0  }
   0x4 LB: > { %s767_s18 = sadd.s32 4294967295, %s949_s17   ;;  %s768_s19 = sadd.s32 4294967294, %s949_s17   ;;  %s949_s17 = sphi %s984_s17, %s16_s17   ;;  %s945_s16 = sphi %s982_s16, %s1230_s16   ;;  %s941_s15 = sphi %s980_s15, %s1229_s15   ;;  %s937_s14 = sphi %s978_s14, %s1228_s14   ;;  %s933_s13 = sphi %s976_s13, %s1227_s13   ;;  %s929_s12 = sphi %s974_s12, %s1226_s12  }
   0x5   : > { %s28_s20 = sadd.s32 1, %s945_s16  ;;  %s105_s21 = sadd.s32 1, %s937_s14 }
   0x6   : > { %p30_p0 = scmp.ge.s32.totalorder %s28_s20, 2  ;;  %p115_p1 = scmp.ne.s32.totalorder %s937_s14, %s933_s13 }
   0x7   : > { %p116_p2 = scmp.eq.s32.totalorder %s767_s18, 1  ;;  %p121_p3 = scmp.ne.s32.totalorder %s933_s13, %s929_s12 }
   0x8   : > { %s1232_s20 = smov (%p30_p0, %s28_s20), 0  ;;  %p122_p5 = scmp.eq.s32.totalorder %s768_s19, 1 }
   0x9   : > { %p1014_p4 = por %p116_p2, %p115_p1  ;;  %s102_s23 = ssub.s32 %s945_s16, %s1232_s20 }
   0xa   : > { %p771_p6 = scmp.ge.s32.totalorder %s949_s17, 1  ;;  %p103_p7 = scmp.eq.s32.totalorder %s102_s23, 0 }
   0xb   : > { %p1021_p8 = por %p122_p5, %p121_p3  ;;  %p161_p9 = scmp.lt.s32.totalorder %s949_s17, 3 }
   0xc   : > { %s1027_s25 = scalar_select %p103_p7, %s937_s14, %s105_s21  }
   0xd   : > { %p162_p10 = pnand %p771_p6, %p161_p9 }
   0xe   : > { %s773_s26 = sshll.u32 (!%p162_p10), %s941_s15, 3  ;;  %s187_s6 = sand.u32 (!%p162_p10), 1, %s933_s13  }
   0xf   : > { %165 = sbr.rel (%p162_p10) target bundleno = 367 (0x16f), region = 32  ;;  %p192_p11 = scmp.lt.s32.totalorder (!%p162_p10), %s773_s26, 15 }
  0x10   : > { %s1160_s7 = sshll.u32 (!%p162_p10), %s187_s6, 3  ;;  %s778_s10 = sshll.u32 (!%p162_p10), %s941_s15, 7 }
  0x11   : > { %s189_s11 = scalar_lea.vmem (!%p162_p10), [#allocation3], %s1160_s7  ;;  %s692_s23 = scalar_lea.hbm (!%p162_p10), %s1223_s3, %s778_s10 }
  0x12   : > { %s694_s18 = sshll.u32 (!%p162_p10), %s189_s11, 4  ;;  %s953_s15 = smov (!%p162_p10), [#allocation3]   ;;  %s695_s18 = int_to_ptr.vmem [resolvable:$true] %s694_s18 }
  0x13   : > { %s877_s28 = sshll.u32 (!%p162_p10), %s953_s15, 4  ;;  %s878_s28 = int_to_ptr.vmem [resolvable:$false] %s877_s28 }
  0x14   : > { %vm206_vm0 = vcmask 2048   ;;  %v951_v0 = vmov 0.0   ;;  %s1234_s26 = smov (!%p192_p11, %s773_s26), 15  ;;  %vm351_vm1 = vcmask 1042432   ;;  %vm585_vm2 = vcmask 1041409   ;;  %s879_s29 = scalar_lea.vmem %s878_s28, 256 }
  0x15   : > { %208 = vst.msk [vmem:[#allocation2 + $0x4] sm:$0x7] %vm206_vm0, %v951_v0  ;;  %207 = vst.msk [vmem:[#allocation2] sm:$0x7] %vm206_vm0, %v951_v0  ;;  %s781_s27 = sshll.u32 %s1234_s26, 5  ;;  %vm588_vm3 = vcmask 1042434   ;;  %p880_p1 = scmp.lt.s32.totalorder %s695_s18, %s878_s28 }
  0x16   : > { %209 = vst.msk [vmem:[#allocation2 + $0x8] sm:$0x7] %vm206_vm0, %v951_v0  ;;  %210 = vst.msk [vmem:[#allocation2 + $0xc] sm:$0x7] %vm206_vm0, %v951_v0  ;;  %s1041_s30 = scalar_lea.vmem %s1220_s0, %s781_s27  ;;  %vm591_vm4 = vcmask 1043459   ;;  %vm594_vm5 = vcmask 1044484  }
  0x17   : > { %211 = vst.msk [vmem:[#allocation2 + $0x10] sm:$0x7] %vm206_vm0, %v951_v0  ;;  %212 = vst.msk [vmem:[#allocation2 + $0x14] sm:$0x7] %vm206_vm0, %v951_v0  ;;  %v227_v1 = vld [vmem:[%s1041_s30 + $0x20] sm:$0x77] }
  0x18   : > { %213 = vst.msk [vmem:[#allocation2 + $0x18] sm:$0x7] %vm206_vm0, %v951_v0  ;;  %214 = vst.msk [vmem:[#allocation2 + $0x1c] sm:$0x7] %vm206_vm0, %v951_v0  ;;  %v228_v2 = vld [vmem:[%s1041_s30 + $0x28] sm:$0x77]  ;;  %v291_v5 = vcombine.high %v227_v1, %v227_v1 }
  0x19   : > { %v229_v3 = vld [vmem:[%s1041_s30 + $0x30] sm:$0x77]  ;;  %v230_v4 = vld [vmem:[%s1041_s30 + $0x38] sm:$0x77]  ;;  %v292_v6 = vcombine.high %v228_v2, %v228_v2  ;;  %v369_v7 = vsel %vm351_vm1, %v227_v1, 0.0  ;;  %v372_v12 = vsel %vm351_vm1, %v228_v2, 0.0 }
  0x1a   : > { %v231_v8 = vld [vmem:[%s1041_s30 + $0x40] sm:$0x77]  ;;  %v232_v9 = vld [vmem:[%s1041_s30 + $0x48] sm:$0x77]  ;;  %v293_v10 = vcombine.high %v229_v3, %v229_v3  ;;  %v370_v11 = vsel %vm351_vm1, %v291_v5, 0.0  ;;  %v294_v15 = vcombine.high %v230_v4, %v230_v4  ;;  %v376_v17 = vsel %vm351_vm1, %v229_v3, 0.0 }
  0x1b   : > { %v233_v13 = vld [vmem:[%s1041_s30 + $0x50] sm:$0x77]  ;;  %v295_v14 = vcombine.high %v231_v8, %v231_v8  ;;  %v371_v16 = vadd.f32 %v370_v11, %v369_v7  ;;  %v234_v18 = vld [vmem:[%s1041_s30 + $0x58] sm:$0x77]  ;;  %v296_v19 = vcombine.high %v232_v9, %v232_v9  ;;  %v223_v20 = vld [vmem:[%s1041_s30] sm:$0x77] }
  0x1c   : > { %v374_v21 = vsel %vm351_vm1, %v292_v6, 0.0  ;;  %v386_v22 = vsel %vm351_vm1, %v231_v8, 0.0  ;;  %v389_v24 = vsel %vm351_vm1, %v232_v9, 0.0  ;;  %v224_v25 = vld [vmem:[%s1041_s30 + $0x8] sm:$0x77]  ;;  %v380_v27 = vsel %vm351_vm1, %v230_v4, 0.0 }
  0x1d   : > { %v387_v23 = vsel %vm351_vm1, %v295_v14, 0.0  ;;  %v373_v26 = vadd.f32 %v372_v12, %v371_v16  ;;  %v297_v28 = vcombine.high %v233_v13, %v233_v13  ;;  %v378_v30 = vsel %vm351_vm1, %v293_v10, 0.0  ;;  %v225_v37 = vld [vmem:[%s1041_s30 + $0x10] sm:$0x77]  ;;  %v235_v43 = vld [vmem:[%s1041_s30 + $0x60] sm:$0x77] }
  0x1e   : > { %v388_v29 = vadd.f32 %v387_v23, %v386_v22  ;;  %v298_v31 = vcombine.high %v234_v18, %v234_v18  ;;  %v391_v32 = vsel %vm351_vm1, %v296_v19, 0.0  ;;  %v287_v33 = vcombine.high %v223_v20, %v223_v20  ;;  %v226_v47 = vld [vmem:[%s1041_s30 + $0x18] sm:$0x77]  ;;  %v236_v49 = vld [vmem:[%s1041_s30 + $0x68] sm:$0x77]  ;;  %s681_s26 = scalar_lea.sflag [#allocation4], %s187_s6 }
  0x1f   : > { %v375_v34 = vadd.f32 %v374_v21, %v373_v26  ;;  %v382_v35 = vsel %vm351_vm1, %v294_v15, 0.0  ;;  %v288_v38 = vcombine.high %v224_v25, %v224_v25  ;;  %v393_v39 = vsel %vm351_vm1, %v233_v13, 0.0  ;;  %v237_v57 = vld [vmem:[%s1041_s30 + $0x70] sm:$0x77]  ;;  %v239_v3 = vld [vmem:[%s1041_s30 + $0x80] sm:$0x77] }
  0x20   : > { %v390_v36 = vadd.f32 %v389_v24, %v388_v29  ;;  %v352_v40 = vsel %vm351_vm1, %v223_v20, 0.0  ;;  %v353_v41 = vsel %vm351_vm1, %v287_v33, 0.0  ;;  %v355_v42 = vsel %vm351_vm1, %v224_v25, 0.0  ;;  %v240_v8 = vld [vmem:[%s1041_s30 + $0x88] sm:$0x77]  ;;  %s873_s27 = scalar_lea.vmem %s695_s18, 128 }
  0x21   : > { %v377_v44 = vadd.f32 %v376_v17, %v375_v34  ;;  %v395_v46 = vsel %vm351_vm1, %v297_v28, 0.0  ;;  %v354_v48 = vadd.f32 %v353_v41, %v352_v40  ;;  %v397_v50 = vsel %vm351_vm1, %v234_v18, 0.0  ;;  %v238_v12 = vld [vmem:[%s1041_s30 + $0x78] sm:$0x77]  ;;  %v241_v21 = vld [vmem:[%s1041_s30 + $0x90] sm:$0x77]  ;;  %p874_p12 = scmp.ne.s32.totalorder %s695_s18, %s873_s27  ;;  %p881_p2 = scmp.lt.s32.totalorder %s879_s29, %s873_s27 }
  0x22   : > { %v392_v45 = vadd.f32 %v391_v32, %v390_v36  ;;  %v399_v51 = vsel %vm351_vm1, %v298_v31, 0.0  ;;  %v289_v52 = vcombine.high %v225_v37, %v225_v37  ;;  %v357_v53 = vsel %vm351_vm1, %v288_v38, 0.0  ;;  %v244_v32 = vld [vmem:[%s1041_s30 + $0xa8] sm:$0x77]  ;;  %v242_v38 = vld [vmem:[%s1041_s30 + $0x98] sm:$0x77] }
  0x23   : > { %v379_v54 = vadd.f32 %v378_v30, %v377_v44  ;;  %v356_v56 = vadd.f32 %v355_v42, %v354_v48  ;;  %v299_v58 = vcombine.high %v235_v43, %v235_v43  ;;  %v290_v59 = vcombine.high %v226_v47, %v226_v47  ;;  %v245_v44 = vld [vmem:[%s1041_s30 + $0xb0] sm:$0x77]  ;;  %p875_p13 = pnand %p874_p12, %p1014_p4  ;;  %p882_p3 = por %p881_p2, %p880_p1 }
  0x24   : > { %v394_v55 = vadd.f32 %v393_v39, %v392_v45  ;;  %v359_v60 = vsel %vm351_vm1, %v225_v37, 0.0  ;;  %v300_v61 = vcombine.high %v236_v49, %v236_v49  ;;  %v403_v62 = vsel %vm351_vm1, %v235_v43, 0.0 }
  0x25   : > { %v381_v63 = vadd.f32 %v380_v27, %v379_v54  ;;  %v358_v1 = vadd.f32 %v357_v53, %v356_v56  ;;  %v404_v2 = vsel %vm351_vm1, %v299_v58, 0.0  ;;  %v361_v4 = vsel %vm351_vm1, %v289_v52, 0.0  ;;  %v243_v27 = vld [vmem:[%s1041_s30 + $0xa0] sm:$0x77]  ;;  %p876_p0 = pneg %p875_p13 }
  0x26   : > { %v396_v0 = vadd.f32 %v395_v46, %v394_v55  ;;  %v301_v5 = vcombine.high %v237_v57, %v237_v57  ;;  %v405_v6 = vadd.f32 %v404_v2, %v403_v62  ;;  %v406_v7 = vsel %vm351_vm1, %v236_v49, 0.0  ;;  %v247_v46 = vld [vmem:[%s1041_s30 + $0xc0] sm:$0x77]  ;;  %v246_v55 = vld [vmem:[%s1041_s30 + $0xb8] sm:$0x77] }
  0x27   : > { %v383_v9 = vadd.f32 %v382_v35, %v381_v63  ;;  %v360_v11 = vadd.f32 %v359_v60, %v358_v1  ;;  %v408_v13 = vsel %vm351_vm1, %v300_v61, 0.0  ;;  %v363_v14 = vsel %vm351_vm1, %v226_v47, 0.0  ;;  %p883_p5 = pnand %p882_p3, %p876_p0 }
  0x28   : > { %v398_v10 = vadd.f32 %v397_v50, %v396_v0  ;;  %v365_v15 = vsel %vm351_vm1, %v290_v59, 0.0  ;;  %v407_v16 = vadd.f32 %v406_v7, %v405_v6  ;;  %v303_v17 = vcombine.high %v239_v3, %v239_v3  ;;  %v251_v6 = vld [vmem:[%s1041_s30 + $0xe0] sm:$0x77] }
  0x29   : > { %384 = vadd.xlane.f32.xlu0 %v383_v9  ;;  %v362_v19 = vadd.f32 %v361_v4, %v360_v11  ;;  %v410_v20 = vsel %vm351_vm1, %v237_v57, 0.0  ;;  %v304_v22 = vcombine.high %v240_v8, %v240_v8  ;;  %v302_v23 = vcombine.high %v238_v12, %v238_v12  ;;  %v249_v4 = vld [vmem:[%s1041_s30 + $0xd0] sm:$0x77]  ;;  %v252_v11 = vld [vmem:[%s1041_s30 + $0xe8] sm:$0x77] }
  0x2a   : > { %v400_v18 = vadd.f32 %v399_v51, %v398_v10  ;;  %v409_v24 = vadd.f32 %v408_v13, %v407_v16  ;;  %v420_v25 = vsel %vm351_vm1, %v239_v3, 0.0  ;;  %v421_v26 = vsel %vm351_vm1, %v303_v17, 0.0  ;;  %v248_v51 = vld [vmem:[%s1041_s30 + $0xc8] sm:$0x77]  ;;  %v250_v17 = vld [vmem:[%s1041_s30 + $0xd8] sm:$0x77] }
  0x2b   : > { %v364_v28 = vadd.f32 %v363_v14, %v362_v19  ;;  %v412_v29 = vsel %vm351_vm1, %v301_v5, 0.0  ;;  %v422_v30 = vadd.f32 %v421_v26, %v420_v25  ;;  %v423_v31 = vsel %vm351_vm1, %v240_v8, 0.0 }
  0x2c   : > { %v411_v33 = vadd.f32 %v410_v20, %v409_v24  ;;  %v305_v34 = vcombine.high %v241_v21, %v241_v21  ;;  %v425_v35 = vsel %vm351_vm1, %v304_v22, 0.0  ;;  %v414_v37 = vsel %vm351_vm1, %v238_v12, 0.0  ;;  %v253_v24 = vld [vmem:[%s1041_s30 + $0xf0] sm:$0x77] }
  0x2d   : > { %401 = vadd.xlane.f32.xlu0 %v400_v18  ;;  %v366_v36 = vadd.f32 %v365_v15, %v364_v28  ;;  %v424_v39 = vadd.f32 %v423_v31, %v422_v30  ;;  %v307_v40 = vcombine.high %v243_v27, %v243_v27  ;;  %v416_v42 = vsel %vm351_vm1, %v302_v23, 0.0 }
  0x2e   : > { %v413_v41 = vadd.f32 %v412_v29, %v411_v33  ;;  %v427_v43 = vsel %vm351_vm1, %v241_v21, 0.0  ;;  %v308_v45 = vcombine.high %v244_v32, %v244_v32  ;;  %v437_v48 = vsel %vm351_vm1, %v243_v27, 0.0 }
  0x2f   : > { %367 = vadd.xlane.f32.xlu1 %v366_v36  ;;  %v426_v47 = vadd.f32 %v425_v35, %v424_v39  ;;  %v438_v49 = vsel %vm351_vm1, %v307_v40, 0.0  ;;  %v440_v50 = vsel %vm351_vm1, %v244_v32, 0.0  ;;  %v306_v53 = vcombine.high %v242_v38, %v242_v38  ;;  %v254_v39 = vld [vmem:[%s1041_s30 + $0xf8] sm:$0x77] }
  0x30   : > { %v415_v52 = vadd.f32 %v414_v37, %v413_v41  ;;  %v429_v54 = vsel %vm351_vm1, %v305_v34, 0.0  ;;  %v439_v56 = vadd.f32 %v438_v49, %v437_v48  ;;  %v431_v58 = vsel %vm351_vm1, %v242_v38, 0.0 }
  0x31   : > { %v428_v57 = vadd.f32 %v427_v43, %v426_v47  ;;  %v309_v59 = vcombine.high %v245_v44, %v245_v44  ;;  %v442_v60 = vsel %vm351_vm1, %v308_v45, 0.0  ;;  %v311_v63 = vcombine.high %v247_v46, %v247_v46 }
  0x32   : > { %v417_v61 = vadd.f32 %v416_v42, %v415_v52  ;;  %v441_v62 = vadd.f32 %v440_v50, %v439_v56  ;;  %v312_v0 = vcombine.high %v248_v51, %v248_v51  ;;  %v310_v2 = vcombine.high %v246_v55, %v246_v55 }
  0x33   : > { %v430_v1 = vadd.f32 %v429_v54, %v428_v57  ;;  %v444_v3 = vsel %vm351_vm1, %v245_v44, 0.0  ;;  %v454_v5 = vsel %vm351_vm1, %v247_v46, 0.0  ;;  %v433_v7 = vsel %vm351_vm1, %v306_v53, 0.0 }
  0x34   : > { %418 = vadd.xlane.f32.xlu1 %v417_v61  ;;  %v443_v8 = vadd.f32 %v442_v60, %v441_v62  ;;  %v455_v9 = vsel %vm351_vm1, %v311_v63, 0.0  ;;  %v457_v10 = vsel %vm351_vm1, %v248_v51, 0.0  ;;  %v446_v13 = vsel %vm351_vm1, %v309_v59, 0.0  ;;  %v217_v61 = vld [vmem:[#allocation2 + $0x8] sm:$0x7] }
  0x35   : > { %v432_v12 = vadd.f32 %v431_v58, %v430_v1  ;;  %v448_v14 = vsel %vm351_vm1, %v246_v55, 0.0  ;;  %v456_v15 = vadd.f32 %v455_v9, %v454_v5  ;;  %v313_v18 = vcombine.high %v249_v4, %v249_v4  ;;  %v216_v58 = vld [vmem:[#allocation2 + $0x4] sm:$0x7]  ;;  %v215_v63 = vld [vmem:[#allocation2] sm:$0x7] }
  0x36   : > { %v445_v16 = vadd.f32 %v444_v3, %v443_v8  ;;  %v459_v19 = vsel %vm351_vm1, %v312_v0, 0.0  ;;  %v315_v20 = vcombine.high %v251_v6, %v251_v6  ;;  %v450_v22 = vsel %vm351_vm1, %v310_v2, 0.0  ;;  %v218_v3 = vld [vmem:[#allocation2 + $0xc] sm:$0x7]  ;;  %v219_v8 = vld [vmem:[#allocation2 + $0x10] sm:$0x7] }
  0x37   : > { %v434_v21 = vadd.f32 %v433_v7, %v432_v12  ;;  %v458_v23 = vadd.f32 %v457_v10, %v456_v15  ;;  %v316_v25 = vcombine.high %v252_v11, %v252_v11  ;;  %v461_v27 = vsel %vm351_vm1, %v249_v4, 0.0  ;;  %v220_v12 = vld [vmem:[#allocation2 + $0x14] sm:$0x7] }
  0x38   : > { %v447_v26 = vadd.f32 %v446_v13, %v445_v16  ;;  %v471_v28 = vsel %vm351_vm1, %v251_v6, 0.0  ;;  %v472_v29 = vsel %vm351_vm1, %v315_v20, 0.0  ;;  %v314_v30 = vcombine.high %v250_v17, %v250_v17  ;;  %v221_v16 = vld [vmem:[#allocation2 + $0x18] sm:$0x7]  ;;  %v222_v20 = vld [vmem:[#allocation2 + $0x1c] sm:$0x7] }
  0x39   : > { %435 = vadd.xlane.f32.xlu0 %v434_v21  ;;  %v460_v31 = vadd.f32 %v459_v19, %v458_v23  ;;  %v473_v32 = vadd.f32 %v472_v29, %v471_v28  ;;  %v474_v33 = vsel %vm351_vm1, %v252_v11, 0.0  ;;  %v463_v35 = vsel %vm351_vm1, %v313_v18, 0.0 }
  0x3a   : > { %v449_v34 = vadd.f32 %v448_v14, %v447_v26  ;;  %v317_v36 = vcombine.high %v253_v24, %v253_v24  ;;  %v476_v37 = vsel %vm351_vm1, %v316_v25, 0.0  ;;  %v465_v42 = vsel %vm351_vm1, %v250_v17, 0.0 }
  0x3b   : > { %v462_v38 = vadd.f32 %v461_v27, %v460_v31  ;;  %v475_v40 = vadd.f32 %v474_v33, %v473_v32  ;;  %v478_v43 = vsel %vm351_vm1, %v253_v24, 0.0  ;;  %v952_v44 = vmov 0   ;;  %v516_v32 = vld [vmem:[%s1221_s1] sm:$0x7] }
  0x3c   : > { %v451_v41 = vadd.f32 %v450_v22, %v449_v34  ;;  %839 = vset.pattern.permute.xlu0 %v952_v44  ;;  %840 = vset.pattern.permute.xlu1 %v952_v44  ;;  %v467_v47 = vsel %vm351_vm1, %v314_v30, 0.0  ;;  %v318_v48 = vcombine.high %v254_v39, %v254_v39  ;;  %v480_v49 = vsel %vm351_vm1, %v317_v36, 0.0 }
  0x3d   : > { %v464_v45 = vadd.f32 %v463_v35, %v462_v38  ;;  %v477_v46 = vadd.f32 %v476_v37, %v475_v40  ;;  %v482_v52 = vsel %vm351_vm1, %v254_v39, 0.0  ;;  %v558_v26 = vlaneseq }
  0x3e   : > { %452 = vadd.xlane.f32.xlu1 %v451_v41  ;;  %v484_v55 = vsel %vm351_vm1, %v318_v48, 0.0  ;;  %vm597_vm6 = vcmask 1045509   ;;  %vm600_vm7 = vcmask 1046534   ;;  %vm603_vm8 = vcmask 1047559  }
  0x3f   : > { %v466_v50 = vadd.f32 %v465_v42, %v464_v45  ;;  %v479_v51 = vadd.f32 %v478_v43, %v477_v46  ;;  %v559_v28 = vshrl.u32 %v558_v26, 7 }
  0x41   : > { %v468_v53 = vadd.f32 %v467_v47, %v466_v50  ;;  %v481_v54 = vadd.f32 %v480_v49, %v479_v51  ;;  %v560_v30 = vsub.s32 0, %v559_v28  ;;  %v609_v31 = vsub.s32 1, %v559_v28 }
  0x42   : > { %v645_v33 = vsub.s32 2, %v559_v28 }
  0x43   : > { %469 = vadd.xlane.f32.xlu0 %v468_v53  ;;  %v483_v56 = vadd.f32 %v482_v52, %v481_v54  ;;  %v561_v35 = vrot.slane %v516_v32, %v560_v30  ;;  %v610_v36 = vrot.slane %v516_v32, %v609_v31  ;;  %v776_v30 = vld [vmem:[%s1222_s2] ss:$0 sm:$0xff] }
  0x44   : > { %v646_v37 = vrot.slane %v516_v32, %v645_v33 }
  0x45   : > { %v485_v57 = vadd.f32 %v484_v55, %v483_v56 }
  0x47   : > { %486 = vadd.xlane.f32.xlu1 %v485_v57 }
  0xb2   : > { %v385_v59 = vpop.xlane.xlu0 %384 }
  0xb3   : > { %v489_v60 = vadd.f32 %v385_v59, %v216_v58 }
  0xb5   : > { %498 = vst.msk [vmem:[#allocation2 + $0x4] sm:$0x7] %vm206_vm0, %v489_v60 }
  0xb6   : > { %v402_v62 = vpop.xlane.xlu0 %401 }
  0xb7   : > { %v490_v0 = vadd.f32 %v402_v62, %v217_v61 }
  0xb8   : > { %v368_v1 = vpop.xlane.xlu1 %367 }
  0xb9   : > { %499 = vst.msk [vmem:[#allocation2 + $0x8] sm:$0x7] %vm206_vm0, %v490_v0  ;;  %v488_v2 = vadd.f32 %v368_v1, %v215_v63 }
  0xbb   : > { %497 = vst.msk [vmem:[#allocation2] sm:$0x7] %vm206_vm0, %v488_v2 }
  0xbc   : > { %v509_v4 = vld [vmem:[#allocation2 + $0x4] sm:$0x7] }
  0xbd   : > { %525 = vperm.xlu0 %839, %v509_v4   ;;  %v419_v5 = vpop.xlane.xlu1 %418 }
  0xbe   : > { %v491_v6 = vadd.f32 %v419_v5, %v218_v3 }
  0xc0   : > { %500 = vst.msk [vmem:[#allocation2 + $0xc] sm:$0x7] %vm206_vm0, %v491_v6  ;;  %v510_v7 = vld [vmem:[#allocation2 + $0x8] sm:$0x7] }
  0xc1   : > { %530 = vperm.xlu1 %840, %v510_v7  }
  0xc2   : > { %v436_v9 = vpop.xlane.xlu0 %435  ;;  %v508_v10 = vld [vmem:[#allocation2] sm:$0x7] }
  0xc3   : > { %v492_v11 = vadd.f32 %v436_v9, %v219_v8 }
  0xc5   : > { %501 = vst.msk [vmem:[#allocation2 + $0x10] sm:$0x7] %vm206_vm0, %v492_v11  ;;  %520 = vperm.xlu1 %840, %v508_v10  }
  0xc7   : > { %v453_v13 = vpop.xlane.xlu1 %452  ;;  %v511_v14 = vld [vmem:[#allocation2 + $0xc] sm:$0x7] }
  0xc8   : > { %v493_v15 = vadd.f32 %v453_v13, %v220_v12 }
  0xc9   : > { %535 = vperm.xlu1 %840, %v511_v14  }
  0xca   : > { %502 = vst.msk [vmem:[#allocation2 + $0x14] sm:$0x7] %vm206_vm0, %v493_v15 }
  0xcc   : > { %v470_v17 = vpop.xlane.xlu0 %469  ;;  %v512_v18 = vld [vmem:[#allocation2 + $0x10] sm:$0x7] }
  0xcd   : > { %v494_v19 = vadd.f32 %v470_v17, %v221_v16  ;;  %540 = vperm.xlu1 %840, %v512_v18  }
  0xcf   : > { %503 = vst.msk [vmem:[#allocation2 + $0x18] sm:$0x7] %vm206_vm0, %v494_v19 }
  0xd0   : > { %v487_v21 = vpop.xlane.xlu1 %486 }
  0xd1   : > { %v495_v22 = vadd.f32 %v487_v21, %v222_v20  ;;  %v513_v23 = vld [vmem:[#allocation2 + $0x14] sm:$0x7] }
  0xd2   : > { %545 = vperm.xlu1 %840, %v513_v23  }
  0xd3   : > { %504 = vst.msk [vmem:[#allocation2 + $0x1c] sm:$0x7] %vm206_vm0, %v495_v22 }
  0xd6   : > { %v514_v24 = vld [vmem:[#allocation2 + $0x18] sm:$0x7] }
  0xd7   : > { %550 = vperm.xlu1 %840, %v514_v24  }
  0xda   : > { %v515_v25 = vld [vmem:[#allocation2 + $0x1c] sm:$0x7] }
  0xdb   : > { %555 = vperm.xlu1 %840, %v515_v25  }
 0x138   : > { %v526_v38 = vpop.permute.xlu0 %525 }
 0x139   : > { %v563_v42 = vmul.f32 %v561_v35, %v526_v38  ;;  %v648_v43 = vmul.f32 %v646_v37, %v526_v38  ;;  %v612_v51 = vmul.f32 %v610_v36, %v526_v38 }
 0x13b   : > { %v584_v50 = vrot.slane %v563_v42, 7  ;;  %v664_v53 = vrot.slane %v648_v43, 1 }
 0x13c   : > { %v531_v27 = vpop.permute.xlu1 %530 }
 0x13d   : > { %v564_v44 = vmul.f32 %v561_v35, %v531_v27  ;;  %v613_v48 = vmul.f32 %v610_v36, %v531_v27  ;;  %v649_v55 = vmul.f32 %v646_v37, %v531_v27 }
 0x13f   : > { %v587_v54 = vrot.slane %v564_v44, 6  ;;  %v629_v61 = vrot.slane %v613_v48, 7 }
 0x140   : > { %v521_v29 = vpop.permute.xlu1 %520 }
 0x141   : > { %v611_v40 = vmul.f32 %v610_v36, %v521_v29  ;;  %v647_v41 = vmul.f32 %v646_v37, %v521_v29  ;;  %v562_v45 = vmul.f32 %v561_v35, %v521_v29 }
 0x143   : > { %v627_v46 = vrot.slane %v611_v40, 1  ;;  %v663_v49 = vrot.slane %v647_v41, 2  ;;  %v586_v57 = vsel %vm585_vm2, %v584_v50, %v562_v45 }
 0x144   : > { %v536_v34 = vpop.permute.xlu1 %535  ;;  %v589_v6 = vsel %vm588_vm3, %v587_v54, %v586_v57 }
 0x145   : > { %v565_v52 = vmul.f32 %v561_v35, %v536_v34  ;;  %v628_v58 = vsel %vm585_vm2, %v612_v51, %v627_v46  ;;  %v614_v59 = vmul.f32 %v610_v36, %v536_v34  ;;  %v665_v62 = vsel %vm585_vm2, %v664_v53, %v663_v49 }
 0x146   : > { %v650_v63 = vmul.f32 %v646_v37, %v536_v34  ;;  %v630_v7 = vsel %vm588_vm3, %v629_v61, %v628_v58  ;;  %v666_v10 = vsel %vm588_vm3, %v649_v55, %v665_v62 }
 0x147   : > { %v590_v2 = vrot.slane %v565_v52, 5  ;;  %v631_v11 = vrot.slane %v614_v59, 6 }
 0x148   : > { %v541_v39 = vpop.permute.xlu1 %540  ;;  %v667_v14 = vrot.slane %v650_v63, 7 }
 0x149   : > { %v566_v56 = vmul.f32 %v561_v35, %v541_v39  ;;  %v615_v0 = vmul.f32 %v610_v36, %v541_v39  ;;  %v651_v3 = vmul.f32 %v646_v37, %v541_v39  ;;  %v592_v19 = vsel %vm591_vm4, %v590_v2, %v589_v6 }
 0x14a   : > { %v632_v27 = vsel %vm591_vm4, %v631_v11, %v630_v7 }
 0x14b   : > { %v593_v8 = vrot.slane %v566_v56, 4  ;;  %v633_v15 = vrot.slane %v615_v0, 5  ;;  %v669_v20 = vrot.slane %v651_v3, 6 }
 0x14d   : > { %v546_v47 = vpop.permute.xlu1 %545  ;;  %v595_v23 = vsel %vm594_vm5, %v593_v8, %v592_v19  ;;  %v634_v32 = vsel %vm594_vm5, %v633_v15, %v632_v27 }
 0x14e   : > { %v567_v60 = vmul.f32 %v561_v35, %v546_v47  ;;  %v616_v4 = vmul.f32 %v610_v36, %v546_v47  ;;  %v652_v13 = vmul.f32 %v646_v37, %v546_v47 }
 0x150   : > { %v596_v12 = vrot.slane %v567_v60, 3  ;;  %v635_v21 = vrot.slane %v616_v4, 4  ;;  %v671_v29 = vrot.slane %v652_v13, 5 }
 0x152   : > { %v551_v1 = vpop.permute.xlu1 %550  ;;  %v598_v28 = vsel %vm597_vm6, %v596_v12, %v595_v23 }
 0x153   : > { %v568_v5 = vmul.f32 %v561_v35, %v551_v1  ;;  %v617_v9 = vmul.f32 %v610_v36, %v551_v1  ;;  %v653_v17 = vmul.f32 %v646_v37, %v551_v1 }
 0x155   : > { %v599_v16 = vrot.slane %v568_v5, 2  ;;  %v637_v24 = vrot.slane %v617_v9, 3  ;;  %v673_v34 = vrot.slane %v653_v17, 4 }
 0x156   : > { %v556_v18 = vpop.permute.xlu1 %555 }
 0x157   : > { %v569_v22 = vmul.f32 %v561_v35, %v556_v18  ;;  %v618_v25 = vmul.f32 %v610_v36, %v556_v18  ;;  %v654_v26 = vmul.f32 %v646_v37, %v556_v18  ;;  %v601_v33 = vsel %vm600_vm7, %v599_v16, %v598_v28 }
 0x158   : > { %v668_v36 = vsel %vm591_vm4, %v667_v14, %v666_v10  ;;  %v636_v37 = vsel %vm597_vm6, %v635_v21, %v634_v32 }
 0x159   : > { %v602_v31 = vrot.slane %v569_v22, 1  ;;  %v639_v35 = vrot.slane %v618_v25, 2  ;;  %v675_v39 = vrot.slane %v654_v26, 3  ;;  %v670_v40 = vsel %vm594_vm5, %v669_v20, %v668_v36 }
 0x15a   : > { %v638_v41 = vsel %vm600_vm7, %v637_v24, %v636_v37  ;;  %v672_v43 = vsel %vm597_vm6, %v671_v29, %v670_v40 }
 0x15b   : > { %v604_v38 = vsel %vm603_vm8, %v602_v31, %v601_v33  ;;  %v640_v44 = vsel %vm603_vm8, %v639_v35, %v638_v41  ;;  %v674_v45 = vsel %vm600_vm7, %v673_v34, %v672_v43 }
 0x15c   : > { %v606_v42 = vadd.f32 %v776_v30, %v604_v38  ;;  %v676_v47 = vsel %vm603_vm8, %v675_v39, %v674_v45 }
 0x15e   : > { %v642_v46 = vadd.f32 %v640_v44, %v606_v42 }
 0x160   : > { %v678_v48 = vadd.f32 %v676_v47, %v642_v46 }
 0x162   : > { %679 = vst [vmem:[%s189_s11] sm:$0xff] %v678_v48 }
 0x163   : > { %886 = shalt.err (!%p883_p5)
}
 0x164   : > { %s887_s30 = scalar_lea.hbm %s692_s23, 128  ;;  %s891_s6 = scalar_lea.hbm %s1223_s3, 256 }
 0x165   : > { %p888_p6 = scmp.ne.s32.totalorder %s692_s23, %s887_s30  ;;  %p892_p10 = scmp.lt.s32.totalorder %s692_s23, %s1223_s3 }
 0x166   : > { %p893_p11 = scmp.lt.s32.totalorder %s891_s6, %s887_s30 }
 0x167   : > { %p889_p7 = pnand %p888_p6, %p1014_p4 }
 0x168   : > { %p894_p12 = por %p893_p11, %p892_p10 }
 0x169   : > { %p890_p9 = pneg %p889_p7 }
 0x16b   : > { %p895_p13 = pnand %p894_p12, %p890_p9 }
 0x16d   : > { %898 = shalt.err (!%p895_p13)
}
 0x16e   : > { %782 = dma.vmem_to_hbm [thread:$0]  (%p1014_p4), %s695_s18, 128, %s692_s23, %s681_s26  }
 0x16f PF: > { %p788_p0 = scmp.ge.s32.totalorder %s949_s17, 2  ;;  %s706_s9 = sand.u32 1, %s929_s12  }
 0x170   : > { %s707_s10 = scalar_lea.sflag [#allocation4], %s706_s9 }
 0x171   : > { %p785_p1 = pnand %p788_p0, %p1021_p8 }
 0x173   : > { %p786_p2 = pneg %p785_p1 }
 0x175   : > { %924 = dma.done.wait (%p786_p2), %s707_s10, 128  }
 0x176   : > { %926 = vsyncadd (%p786_p2), %s707_s10, 4294967168  ;;  %s16_s17 = sadd.s32 1, %s949_s17   ;;  %s1226_s12 = smov %s933_s13 }
 0x177   : > { %p13_p3 = scmp.ge.s32.totalorder %s16_s17, 4   ;;  %s1227_s13 = smov %s937_s14 }
 0x178   : > { %s1228_s14 = smov %s1027_s25  ;;  %s1229_s15 = smov %s945_s16 }
 0x179   : > { %s1230_s16 = smov %s1232_s20  ;;  %15 = sbr.rel (!%p13_p3) target bundleno = 4 (0x4), region = 75 }
 0x17e   :  { %712 = vsyncpa [#allocation4], 1 }
 0x17f   :  { %714 = vsyncpa [#allocation4 + $0x1], 1 }

</bundles_post_ra>
